<compile_context>
chip_gen: v7x
topology: tpu7x:2x2x1
jax: 0.10.0
libtpu: 0.0.40
codegen_flags: <defaults>
</compile_context>

<pallas_src>
import functools

import jax
import jax.numpy as jnp
from jax import lax
from jax.experimental import pallas as pl
from jax.experimental.pallas import tpu as pltpu


# ---------------------------------------------------------------------------
# Kernel 1: per-head fused QKV projection.  grid = (B, H)
#   One (T, C) @ (C, 3*d_k) matmul per grid point; split into Q/K/V slabs.
# ---------------------------------------------------------------------------
def _qkv_proj_kernel(x_ref, w_ref, b_ref, q_ref, k_ref, v_ref, *, d_k):
    x = x_ref[0]                                              # (T, C)
    qkv = jnp.dot(x, w_ref[0], preferred_element_type=jnp.float32) + b_ref[0]
    q_ref[0, 0] = qkv[:, :d_k].astype(q_ref.dtype)
    k_ref[0, 0] = qkv[:, d_k:2 * d_k].astype(k_ref.dtype)
    v_ref[0, 0] = qkv[:, 2 * d_k:].astype(v_ref.dtype)


# ---------------------------------------------------------------------------
# Kernel 2: flash attention + output projection, fused.
#   grid = (B, T//tq, H, T//tkv); h and kv axes are reductions ("arbitrary").
#   Per (b, qi): loop heads; per head: online softmax over KV tiles; when the
#   head finishes, accumulate o_h @ Wout_h into a lane-dense (tq, C) scratch;
#   on the last head write y (+ bias) once.
# ---------------------------------------------------------------------------
def _attn_out_kernel(q_ref, k_ref, v_ref, wo_ref, bo_ref, y_ref,
                     m_sc, l_sc, acc_sc, y_acc, *, tq, tkv):
    qi = pl.program_id(1)
    h = pl.program_id(2)
    ki = pl.program_id(3)
    nh = pl.num_programs(2)
    nk = pl.num_programs(3)

    @pl.when(jnp.logical_and(h == 0, ki == 0))
    def _init_y():
        y_acc[...] = jnp.zeros_like(y_acc)

    @pl.when(ki == 0)
    def _init_stats():
        m_sc[...] = jnp.full_like(m_sc, -jnp.inf)
        l_sc[...] = jnp.zeros_like(l_sc)
        acc_sc[...] = jnp.zeros_like(acc_sc)

    # Skip KV tiles entirely above the diagonal (causal).  Their DMAs are
    # also suppressed by the clamped index_map in the wrapper.
    @pl.when(ki * tkv < (qi + 1) * tq)
    def _compute():
        q = q_ref[0, 0]                                       # (tq,  d_k)
        k = k_ref[0, 0]                                       # (tkv, d_k)
        v = v_ref[0, 0]                                       # (tkv, d_k)

        # q @ k^T contracting on last dims -> no explicit transpose node.
        # Softmax scale is already folded into the Q projection weights.
        s = lax.dot_general(q, k, (((1,), (1,)), ((), ())),
                            preferred_element_type=jnp.float32)   # (tq, tkv)

        row = lax.broadcasted_iota(jnp.int32, (tq, tkv), 0) + qi * tq
        col = lax.broadcasted_iota(jnp.int32, (tq, tkv), 1) + ki * tkv
        s = jnp.where(row >= col, s, -jnp.inf)

        m_prev = m_sc[...]
        m_new = jnp.maximum(m_prev, jnp.max(s, axis=-1, keepdims=True))
        alpha = jnp.exp(m_prev - m_new)
        p = jnp.exp(s - m_new)                                 # f32
        l_sc[...] = alpha * l_sc[...] + jnp.sum(p, axis=-1, keepdims=True)
        acc_sc[...] = alpha * acc_sc[...] + jnp.dot(
            p.astype(v.dtype), v, preferred_element_type=jnp.float32)
        m_sc[...] = m_new

    # Head finished: normalize and fold straight into the output projection.
    @pl.when(ki == nk - 1)
    def _head_done():
        inv_l = pl.reciprocal(l_sc[...], approx=True)          # EUP slot
        o_h = (acc_sc[...] * inv_l).astype(q_ref.dtype)        # (tq, d_k)
        y_acc[...] += jnp.dot(o_h, wo_ref[h],
                              preferred_element_type=jnp.float32)

    @pl.when(jnp.logical_and(h == nh - 1, ki == nk - 1))
    def _finalize():
        y_ref[0] = (y_acc[...] + bo_ref[...]).astype(y_ref.dtype)


# ---------------------------------------------------------------------------
# Wrapper
# ---------------------------------------------------------------------------
def causal_self_attention(x, w_qkv, b_qkv, w_out, b_out, *, n_head,
                          tq=None, tkv=None):
    """x: (B, T, C); w_qkv: (3C, C); b_qkv: (3C,); w_out: (C, C); b_out: (C,).
    Torch Linear convention: y = x @ W.T + b."""
    B, T, C = x.shape
    H = n_head
    assert C % H == 0
    d_k = C // H
    scale = float(d_k) ** (-0.5)

    if tq is None:
        tq = T if T <= 128 else 128
    if tkv is None:
        tkv = T if T <= 128 else 128
    assert T % tq == 0 and T % tkv == 0

    # ---- host-side weight prep (done once, outside the kernels) ----
    def _per_head(w):                         # (C, C) -> (H, C, d_k), pre-T
        return jnp.transpose(w.reshape(H, d_k, C), (0, 2, 1))

    wq_h = _per_head(w_qkv[:C]) * scale       # softmax scale folded into Q
    wk_h = _per_head(w_qkv[C:2 * C])
    wv_h = _per_head(w_qkv[2 * C:])
    w_qkv_h = jnp.concatenate([wq_h, wk_h, wv_h], axis=-1)     # (H, C, 3*d_k)

    bq = b_qkv[:C].reshape(H, d_k) * scale
    bk = b_qkv[C:2 * C].reshape(H, d_k)
    bv = b_qkv[2 * C:].reshape(H, d_k)
    b_qkv_h = jnp.concatenate([bq, bk, bv], axis=-1).reshape(H, 1, 3 * d_k)

    w_out_h = jnp.transpose(w_out).reshape(H, d_k, C)   # per-head out slabs
    b_out2 = b_out.reshape(1, C)

    # ---- 1) per-head fused QKV projection ----
    head_shape = jax.ShapeDtypeStruct((B, H, T, d_k), x.dtype)
    q, k, v = pl.pallas_call(
        functools.partial(_qkv_proj_kernel, d_k=d_k),
        out_shape=(head_shape, head_shape, head_shape),
        grid_spec=pltpu.PrefetchScalarGridSpec(
            num_scalar_prefetch=0,
            grid=(B, H),
            in_specs=[
                pl.BlockSpec((1, T, C), lambda b, h: (b, 0, 0)),
                pl.BlockSpec((1, C, 3 * d_k), lambda b, h: (h, 0, 0)),
                pl.BlockSpec((1, 1, 3 * d_k), lambda b, h: (h, 0, 0)),
            ],
            out_specs=(
                pl.BlockSpec((1, 1, T, d_k), lambda b, h: (b, h, 0, 0)),
                pl.BlockSpec((1, 1, T, d_k), lambda b, h: (b, h, 0, 0)),
                pl.BlockSpec((1, 1, T, d_k), lambda b, h: (b, h, 0, 0)),
            ),
        ),
        compiler_params=pltpu.CompilerParams(
            dimension_semantics=("parallel", "parallel")),
    )(x, w_qkv_h, b_qkv_h)

    # ---- 2) flash attention + output projection (fused) ----
    def _kv_map(b, qi, h, ki):
        # Clamp above-diagonal (skipped) tiles to the last computed tile so
        # the pipeline does not DMA K/V blocks that are never used.
        last_valid = ((qi + 1) * tq - 1) // tkv
        return (b, h, jnp.minimum(ki, last_valid), 0)

    flash = functools.partial(_attn_out_kernel, tq=tq, tkv=tkv)
    y = pl.pallas_call(
        flash,
        out_shape=jax.ShapeDtypeStruct((B, T, C), x.dtype),
        grid_spec=pltpu.PrefetchScalarGridSpec(
            num_scalar_prefetch=0,
            grid=(B, T // tq, H, T // tkv),
            in_specs=[
                pl.BlockSpec((1, 1, tq, d_k),
                             lambda b, qi, h, ki: (b, h, qi, 0)),
                pl.BlockSpec((1, 1, tkv, d_k), _kv_map),
                pl.BlockSpec((1, 1, tkv, d_k), _kv_map),
                # Full out-projection weights resident in VMEM for the whole
                # kernel (index never changes -> single DMA).
                pl.BlockSpec((H, d_k, C), lambda b, qi, h, ki: (0, 0, 0)),
                pl.BlockSpec((1, C), lambda b, qi, h, ki: (0, 0)),
            ],
            out_specs=pl.BlockSpec((1, tq, C),
                                   lambda b, qi, h, ki: (b, qi, 0)),
            scratch_shapes=[
                pltpu.VMEM((tq, 1), jnp.float32),     # running max m
                pltpu.VMEM((tq, 1), jnp.float32),     # running sum l
                pltpu.VMEM((tq, d_k), jnp.float32),   # per-head attn accum
                pltpu.VMEM((tq, C), jnp.float32),     # output-proj accum
            ],
        ),
        compiler_params=pltpu.CompilerParams(
            dimension_semantics=("parallel", "parallel",
                                 "arbitrary", "arbitrary"),
            vmem_limit_bytes=32 * 1024 * 1024),
    )(q, k, v, w_out_h, b_out2)

    return y


# ---------------------------------------------------------------------------
# Pure-JAX mirror of the PyTorch forward (dropout = identity)
# ---------------------------------------------------------------------------
def _reference(x, w_qkv, b_qkv, w_out, b_out, *, n_head):
    B, T, C = x.shape
    d_k = C // n_head
    scale = d_k ** (-0.5)
    qkv = x @ w_qkv.T + b_qkv                              # (B, T, 3C)
    qkv = qkv.reshape(B, T, 3, n_head, d_k).transpose(2, 0, 3, 1, 4)
    q, k, v = qkv[0], qkv[1], qkv[2]                       # (B, H, T, d_k)
    s = jnp.einsum("bhqd,bhkd->bhqk", q, k) * scale
    mask = jnp.tril(jnp.ones((T, T), dtype=bool))
    s = jnp.where(mask[None, None], s, -jnp.inf)
    p = jax.nn.softmax(s, axis=-1)
    o = jnp.einsum("bhqk,bhkd->bhqd", p, v)
    o = o.transpose(0, 2, 1, 3).reshape(B, T, C)
    return o @ w_out.T + b_out


if __name__ == "__main__":
    # Small config consistent with the module: B=2, T=8, n_embd=32, n_head=4.
    B, T, C, n_head = 2, 8, 32, 4

    key = jax.random.PRNGKey(0)
    kx, k1, k2, k3, k4 = jax.random.split(key, 5)

    x = jax.random.normal(kx, (B, T, C), dtype=jnp.float32)
    w_qkv = jax.random.normal(k1, (3 * C, C), dtype=jnp.float32) * 0.05
    b_qkv = jax.random.normal(k2, (3 * C,), dtype=jnp.float32) * 0.05
    w_out = jax.random.normal(k3, (C, C), dtype=jnp.float32) * 0.05
    b_out = jax.random.normal(k4, (C,), dtype=jnp.float32) * 0.05

    out = causal_self_attention(x, w_qkv, b_qkv, w_out, b_out, n_head=n_head)
    out = jax.block_until_ready(out)

    ref = _reference(x, w_qkv, b_qkv, w_out, b_out, n_head=n_head)
    assert out.shape == (B, T, C)
    # Tolerance accounts for the approximate (EUP) reciprocal in the softmax
    # normalization and f32-accumulated matmuls.
    assert jnp.allclose(out, ref, atol=1e-2, rtol=1e-2), "mismatch vs reference"

    print("KERNEL_OK")
</pallas_src>

<mosaic_0001>
module attributes {stable_mosaic.version = 11 : i64} {
  func.func @_qkv_proj_kernel(%arg0: i32, %arg1: i32, %arg2: memref<1x8x32xf32, #tpu.memory_space<vmem>>, %arg3: memref<1x32x24xf32, #tpu.memory_space<vmem>>, %arg4: memref<1x1x24xf32, #tpu.memory_space<vmem>>, %arg5: memref<1x1x8x8xf32, #tpu.memory_space<vmem>>, %arg6: memref<1x1x8x8xf32, #tpu.memory_space<vmem>>, %arg7: memref<1x1x8x8xf32, #tpu.memory_space<vmem>>) attributes {dimension_semantics = [#tpu.dimension_semantics<parallel>, #tpu.dimension_semantics<parallel>], iteration_bounds = array<i64: 2, 4>, scalar_prefetch = 0 : i64, scratch_operands = 0 : i64, tpu.core_type = #tpu.core_type<tc>, window_params = [{transform_indices = @transform_0, window_bounds = array<i64: 1, 8, 32>}, {transform_indices = @transform_1, window_bounds = array<i64: 1, 32, 24>}, {transform_indices = @transform_2, window_bounds = array<i64: 1, 1, 24>}, {transform_indices = @transform_3, window_bounds = array<i64: 1, 1, 8, 8>}, {transform_indices = @transform_4, window_bounds = array<i64: 1, 1, 8, 8>}, {transform_indices = @transform_5, window_bounds = array<i64: 1, 1, 8, 8>}]} {
    %c0 = arith.constant 0 : index
    %c0_0 = arith.constant 0 : index
    %c0_1 = arith.constant 0 : index
    %0 = vector.load %arg2[%c0, %c0_0, %c0_1] : memref<1x8x32xf32, #tpu.memory_space<vmem>>, vector<1x8x32xf32>
    %1 = vector.shape_cast %0 : vector<1x8x32xf32> to vector<8x32xf32>
    %c0_2 = arith.constant 0 : index
    %c0_3 = arith.constant 0 : index
    %c0_4 = arith.constant 0 : index
    %2 = vector.load %arg3[%c0_2, %c0_3, %c0_4] : memref<1x32x24xf32, #tpu.memory_space<vmem>>, vector<1x32x24xf32>
    %3 = vector.shape_cast %2 : vector<1x32x24xf32> to vector<32x24xf32>
    %cst = arith.constant dense<0.000000e+00> : vector<8x24xf32>
    %4 = tpu.matmul %1, %3, %cst {dimension_numbers = #tpu.dot_dimension_numbers<[1], [0], [0], [1], [0, 0, 1, 1], [], []>} : vector<8x32xf32>, vector<32x24xf32>, vector<8x24xf32> -> vector<8x24xf32>
    %c0_5 = arith.constant 0 : index
    %c0_6 = arith.constant 0 : index
    %c0_7 = arith.constant 0 : index
    %5 = vector.load %arg4[%c0_5, %c0_6, %c0_7] : memref<1x1x24xf32, #tpu.memory_space<vmem>>, vector<1x1x24xf32>
    %6 = vector.shape_cast %5 : vector<1x1x24xf32> to vector<1x24xf32>
    %7 = vector.broadcast %6 : vector<1x24xf32> to vector<8x24xf32>
    %8 = arith.addf %4, %7 : vector<8x24xf32>
    %9 = vector.extract_strided_slice %8 {offsets = [0, 0], sizes = [8, 8], strides = [1, 1]} : vector<8x24xf32> to vector<8x8xf32>
    %c0_8 = arith.constant 0 : index
    %c0_9 = arith.constant 0 : index
    %c0_10 = arith.constant 0 : index
    %c0_11 = arith.constant 0 : index
    %10 = vector.load %arg5[%c0_8, %c0_9, %c0_10, %c0_11] : memref<1x1x8x8xf32, #tpu.memory_space<vmem>>, vector<1x1x8x8xf32>
    %11 = vector.shape_cast %10 : vector<1x1x8x8xf32> to vector<8x8xf32>
    %12 = vector.shape_cast %9 : vector<8x8xf32> to vector<1x1x8x8xf32>
    tpu.vector_store %arg5[%c0_8, %c0_9, %c0_10, %c0_11], %12 {strides = array<i32>} : memref<1x1x8x8xf32, #tpu.memory_space<vmem>>, vector<1x1x8x8xf32>,
    %13 = vector.extract_strided_slice %8 {offsets = [0, 8], sizes = [8, 8], strides = [1, 1]} : vector<8x24xf32> to vector<8x8xf32>
    %c0_12 = arith.constant 0 : index
    %c0_13 = arith.constant 0 : index
    %c0_14 = arith.constant 0 : index
    %c0_15 = arith.constant 0 : index
    %14 = vector.load %arg6[%c0_12, %c0_13, %c0_14, %c0_15] : memref<1x1x8x8xf32, #tpu.memory_space<vmem>>, vector<1x1x8x8xf32>
    %15 = vector.shape_cast %14 : vector<1x1x8x8xf32> to vector<8x8xf32>
    %16 = vector.shape_cast %13 : vector<8x8xf32> to vector<1x1x8x8xf32>
    tpu.vector_store %arg6[%c0_12, %c0_13, %c0_14, %c0_15], %16 {strides = array<i32>} : memref<1x1x8x8xf32, #tpu.memory_space<vmem>>, vector<1x1x8x8xf32>,
    %17 = vector.extract_strided_slice %8 {offsets = [0, 16], sizes = [8, 8], strides = [1, 1]} : vector<8x24xf32> to vector<8x8xf32>
    %c0_16 = arith.constant 0 : index
    %c0_17 = arith.constant 0 : index
    %c0_18 = arith.constant 0 : index
    %c0_19 = arith.constant 0 : index
    %18 = vector.load %arg7[%c0_16, %c0_17, %c0_18, %c0_19] : memref<1x1x8x8xf32, #tpu.memory_space<vmem>>, vector<1x1x8x8xf32>
    %19 = vector.shape_cast %18 : vector<1x1x8x8xf32> to vector<8x8xf32>
    %20 = vector.shape_cast %17 : vector<8x8xf32> to vector<1x1x8x8xf32>
    tpu.vector_store %arg7[%c0_16, %c0_17, %c0_18, %c0_19], %20 {strides = array<i32>} : memref<1x1x8x8xf32, #tpu.memory_space<vmem>>, vector<1x1x8x8xf32>,
    return
  }
  func.func @transform_0(%arg0: i32, %arg1: i32) -> (i32, i32, i32) {
    %c0_i32 = arith.constant 0 : i32
    %c0_i32_0 = arith.constant 0 : i32
    %c0_i32_1 = arith.constant 0 : i32
    return %arg0, %c0_i32, %c0_i32_0 : i32, i32, i32
  }
  func.func @transform_1(%arg0: i32, %arg1: i32) -> (i32, i32, i32) {
    %c0_i32 = arith.constant 0 : i32
    %c0_i32_0 = arith.constant 0 : i32
    %c0_i32_1 = arith.constant 0 : i32
    return %arg1, %c0_i32, %c0_i32_0 : i32, i32, i32
  }
  func.func @transform_2(%arg0: i32, %arg1: i32) -> (i32, i32, i32) {
    %c0_i32 = arith.constant 0 : i32
    %c0_i32_0 = arith.constant 0 : i32
    %c0_i32_1 = arith.constant 0 : i32
    return %arg1, %c0_i32, %c0_i32_0 : i32, i32, i32
  }
  func.func @transform_3(%arg0: i32, %arg1: i32) -> (i32, i32, i32, i32) {
    %c0_i32 = arith.constant 0 : i32
    %c0_i32_0 = arith.constant 0 : i32
    %c0_i32_1 = arith.constant 0 : i32
    return %arg0, %arg1, %c0_i32, %c0_i32_0 : i32, i32, i32, i32
  }
  func.func @transform_4(%arg0: i32, %arg1: i32) -> (i32, i32, i32, i32) {
    %c0_i32 = arith.constant 0 : i32
    %c0_i32_0 = arith.constant 0 : i32
    %c0_i32_1 = arith.constant 0 : i32
    return %arg0, %arg1, %c0_i32, %c0_i32_0 : i32, i32, i32, i32
  }
  func.func @transform_5(%arg0: i32, %arg1: i32) -> (i32, i32, i32, i32) {
    %c0_i32 = arith.constant 0 : i32
    %c0_i32_0 = arith.constant 0 : i32
    %c0_i32_1 = arith.constant 0 : i32
    return %arg0, %arg1, %c0_i32, %c0_i32_0 : i32, i32, i32, i32
  }
}

</mosaic_0001>

<bundles_post_ra>
// kernel: tpu_custom_call.1
= control target key start
LH: loop header
LB: loop body
LE: loop exit
PB: predicated region body
PF: predicated region fallthrough
CT: control target
= control target key end

     0   :  { %s1162_s0 = inlined_call_operand.vmem [shape: f32[2,8,32], index: 0, kind: input, shape index: {}]   ;;  %s1163_s1 = inlined_call_operand.vmem [shape: f32[4,32,24], index: 1, kind: input, shape index: {}]   ;;  %s1164_s2 = inlined_call_operand.vmem [shape: f32[4,1,24], index: 2, kind: input, shape index: {}]   ;;  %s1165_s3 = inlined_call_operand.hbm [shape: f32[2,4,8,8], index: 3, kind: output, shape index: {0}]   ;;  %s1166_s4 = inlined_call_operand.hbm [shape: f32[2,4,8,8], index: 4, kind: output, shape index: {1}]   ;;  %s1167_s5 = inlined_call_operand.hbm [shape: f32[2,4,8,8], index: 5, kind: output, shape index: {2}]  }
   0x1   :  { %1171 = sst [smem:[#allocation9_spill]] %s1163_s1 }
   0x2   :  { %11 = vsyncpa [#allocation3], 0 }
   0x3   :  { %13 = vsyncpa [#allocation3 + $0x1], 0 }
   0x4   :  { %14 = vsyncpa [#allocation5], 0 }
   0x5   :  { %16 = vsyncpa [#allocation5 + $0x1], 0  ;;  %s928_s18 = smov 0   ;;  %s930_s19 = smov 0  }
   0x6   :  { %s932_s20 = smov 0   ;;  %s934_s21 = smov 0  }
   0x7   :  { %s936_s22 = smov 0   ;;  %s938_s23 = smov 0  }
   0x8   :  { %s940_s24 = smov 0   ;;  %s942_s25 = smov 0  }
   0x9 LB: > { %s1169_s26 = sadd.s32 4294967295, %s888_s25   ;;  %s1168_s27 = sadd.s32 4294967294, %s888_s25   ;;  %s888_s25 = sphi %s942_s25, %s22_s25   ;;  %s884_s24 = sphi %s940_s24, %s1184_s24   ;;  %s880_s23 = sphi %s938_s23, %s1183_s23   ;;  %s876_s22 = sphi %s936_s22, %s1182_s22   ;;  %s872_s21 = sphi %s934_s21, %s1181_s21   ;;  %s868_s20 = sphi %s932_s20, %s1180_s20   ;;  %s864_s19 = sphi %s930_s19, %s1179_s19   ;;  %s860_s18 = sphi %s928_s18, %s1178_s18  }
   0xa   : > { %s31_s28 = sadd.s32 1, %s880_s23  ;;  %s34_s29 = sadd.s32 1, %s884_s24 }
   0xb   : > { %p32_p0 = scmp.ge.s32.totalorder %s31_s28, 4  ;;  %p131_p1 = scmp.ne.s32.totalorder %s868_s20, %s864_s19 }
   0xc   : > { %p132_p2 = scmp.eq.s32.totalorder %s1169_s26, 7  ;;  %p137_p5 = scmp.ne.s32.totalorder %s864_s19, %s860_s18 }
   0xd   : > { %s1186_s28 = smov (%p32_p0, %s31_s28), 0  ;;  %s1188_s29 = smov (!%p32_p0, %s34_s29), %s884_s24 }
   0xe   : > { %s117_s30 = ssub.s32 %s880_s23, %s1186_s28  ;;  %p981_p3 = por %p132_p2, %p131_p1 }
   0xf   : > { %p36_p4 = scmp.ge.s32.totalorder %s1188_s29, 2  ;;  %p138_p6 = scmp.eq.s32.totalorder %s1168_s27, 7 }
  0x10   : > { %p605_p7 = scmp.ge.s32.totalorder %s888_s25, 1  ;;  %p233_p9 = scmp.lt.s32.totalorder %s888_s25, 9 }
  0x11   : > { %s1190_s29 = smov (%p36_p4, %s1188_s29), 0  ;;  %p992_p8 = por %p138_p6, %p137_p5 }
  0x12   : > { %s116_s8 = ssub.s32 %s884_s24, %s1190_s29  ;;  %s121_s9 = sadd.s32 1, %s868_s20 }
  0x13   : > { %s118_s10 = sor.u32 %s117_s30, %s116_s8  ;;  %p234_p10 = pnand %p605_p7, %p233_p9 }
  0x14   : > { %p119_p11 = scmp.eq.s32.totalorder %s118_s10, 0  ;;  %p282_p12 = scmp.lt.s32.totalorder (!%p234_p10), %s872_s21, 3  ;;  %v890_v0 = vmov (!%p234_p10), 0.0|0.0   ;;  %vm891_vm0 = vmmov (!%p234_p10), 0   ;;  %v892_v1 = vmov (!%p234_p10), 0.0   ;;  %vm302_vm1 = vcmask (!%p234_p10), 261120  }
  0x15   : > { %237 = sbr.rel (%p234_p10) target bundleno = 408 (0x198), region = 32  ;;  %p278_p13 = scmp.lt.s32.totalorder (!%p234_p10), %s876_s22, 1  ;;  %642 = vmatprep.subr.bf16.mxu0 (!%p234_p10), %v890_v0  ;;  %639 = vmatprep.mubr.msk.f32.mxu0 (!%p234_p10), %vm891_vm0, %v892_v1  ;;  %vm376_vm2 = vcmask (!%p234_p10), 64512  }
  0x16   : > { %s1001_s11 = scalar_select %p119_p11, %s868_s20, %s121_s9  }
  0x17   : > { %s1174_s1 = sld [smem:[#allocation9_spill]] (!%p234_p10)  ;;  %s617_s15 = sshll.u32 (!%p234_p10), %s876_s22, 2 }
  0x1c   : > { %s283_s12 = scalar_select %p282_p12, %s872_s21, 3 }
  0x1d   : > { %s279_s13 = scalar_select %p278_p13, %s876_s22, 1 }
  0x1e   : > { %s625_s14 = sshll.u32 %s283_s12, 5 }
  0x1f   : > { %s286_s17 = scalar_lea.vmem %s1174_s1, %s625_s14  ;;  %s609_s30 = sshll.u32 %s279_s13, 3 }
  0x20   : > { %v291_v2 = vld [vmem:[%s286_s17] sm:$0xff]  ;;  %v292_v3 = vld [vmem:[%s286_s17 + $0x8] sm:$0xff]  ;;  %v293_v4 = vld [vmem:[%s286_s17 + $0x10] sm:$0xff]  ;;  %s281_s10 = scalar_lea.vmem %s1162_s0, %s609_s30  ;;  %s261_s14 = sand.u32 1, %s864_s19  }
  0x21   : > { %v643_v5 = vpack.c.bf16 %v292_v3, %v291_v2  ;;  %v294_v6 = vld [vmem:[%s286_s17 + $0x18] sm:$0xff]  ;;  %v290_v8 = vld [vmem:[%s281_s10] sm:$0xff]  ;;  %s1015_s16 = sshll.u32 %s261_s14, 3  ;;  %s289_s13 = scalar_lea.vmem %s1164_s2, %s283_s12 }
  0x22   : > { %v646_v7 = vpack.c.bf16 %v294_v6, %v293_v4  ;;  %s409_s17 = sadd.s32 %s872_s21, %s617_s15  ;;  %v612_v9 = vld [vmem:[%s289_s13] ss:$0 sm:$0xff]  ;;  %s263_s30 = scalar_lea.vmem [#allocation2], %s1015_s16 }
  0x23   : > { %644 = vmatpush3.bf16.msra.mxu0 %v643_v5  ;;  %s1021_s1 = sshll.u32 %s409_s17, 7  ;;  %s413_s8 = sshll.u32 %s263_s30, 4  ;;  %s1030_s8 = int_to_ptr.vmem [resolvable:$true] %s413_s8 }
  0x24   : > { %645 = vmatprep.subr.bf16.mxu0 %v890_v0  ;;  %s1028_s10 = scalar_lea.hbm %s1165_s3, %s1021_s1  ;;  %s893_s21 = smov 120  }
  0x25   : > { %s388_s26 = scalar_lea.sflag [#allocation3], %s261_s14  ;;  %s734_s27 = scalar_lea.vmem %s1030_s8, 128 }
  0x26   : > { %p735_p0 = scmp.ne.s32.totalorder %s1030_s8, %s734_s27  ;;  %s894_s12 = smov [#allocation2]  }
  0x27   : > { %647 = vmatpush3.bf16.msra.mxu0 %v646_v7  ;;  %s738_s15 = sshll.u32 %s894_s12, 4  ;;  %s739_s15 = int_to_ptr.vmem [resolvable:$false] %s738_s15 }
  0x28   : > { %p736_p1 = pnand %p735_p0, %p981_p3  ;;  %s740_s13 = scalar_lea.vmem %s739_s15, 256 }
  0x29   : > { %p741_p4 = scmp.lt.s32.totalorder %s1030_s8, %s739_s15  ;;  %p742_p5 = scmp.lt.s32.totalorder %s740_s13, %s734_s27 }
  0x2a   : > { %640 = vmatmul.mubr.msk.f32.vlgmr.msra.gmra.mrb[0].mxu0 %vm302_vm1, %v290_v8  ;;  %p737_p2 = pneg %p736_p1 }
  0x2b   : > { %p743_p6 = por %p742_p5, %p741_p4 }
  0x2d   : > { %p744_p7 = pnand %p743_p6, %p737_p2 }
  0xfd   : > { %v372_v10 = vpop.f32.mrb[0].mxu0 }
  0xfe   : > { %v373_v11 = vadd.f32 %v612_v9, %v372_v10  ;;  %v641_v12 = vpop.f32.mrb[1].mxu0 }
 0x100   : > { %379 = vrot.lane.b32.xlu0 %v373_v11, %s893_s21  ;;  %377 = vst.msk [vmem:[%s263_s30] sm:$0xff] %vm376_vm2, %v373_v11 }
 0x101   : > { %747 = shalt.err (!%p744_p7)
}
 0x102   : > { %s748_s14 = scalar_lea.hbm %s1028_s10, 128  ;;  %s752_s22 = scalar_lea.hbm %s1165_s3, 1024 }
 0x103   : > { %p749_p9 = scmp.ne.s32.totalorder %s1028_s10, %s748_s14  ;;  %p753_p12 = scmp.lt.u32.totalorder %s1028_s10, %s1165_s3 }
 0x104   : > { %p754_p13 = scmp.lt.u32.totalorder %s752_s22, %s748_s14  ;;  %p756_p1 = scmp.lt.u32.totalorder %s748_s14, %s1028_s10 }
 0x105   : > { %p750_p10 = pnand %p749_p9, %p981_p3 }
 0x106   : > { %p755_p0 = por %p754_p13, %p753_p12 }
 0x107   : > { %p751_p11 = pneg %p750_p10 }
 0x108   : > { %p757_p2 = por %p756_p1, %p755_p0 }
 0x10a   : > { %p758_p4 = pnand %p757_p2, %p751_p11 }
 0x10c   : > { %761 = shalt.err (!%p758_p4)
}
 0x10d   : > { %648 = dma.vmem_to_hbm [thread:$0]  (%p981_p3), %s1030_s8, 128, %s1028_s10, %s388_s26  }
 0x10e   : > { %s895_s27 = smov 112   ;;  %s1175_s12 = sadd.s32 4294967295, %s888_s25  }
 0x10f   : > { %383 = vrot.lane.b32.xlu0 %v373_v11, %s895_s27  ;;  %s1056_s15 = sand.u32 1, %s1175_s12   ;;  %s270_s13 = scalar_lea.vmem [#allocation4], %s1015_s16 }
 0x110   : > { %s428_s14 = sshll.u32 %s270_s13, 4  ;;  %s1063_s22 = scalar_lea.hbm %s1166_s4, %s1021_s1  ;;  %s1065_s14 = int_to_ptr.vmem [resolvable:$true] %s428_s14 }
 0x111   : > { %s1170_s8 = scalar_lea.vmem [#allocation6], %s1015_s16  ;;  %s393_s26 = scalar_lea.sflag [#allocation5], %s1056_s15 }
 0x112   : > { %s1070_s10 = sshll.u32 %s1170_s8, 4  ;;  %s762_s9 = scalar_lea.vmem %s1065_s14, 128  ;;  %s1098_s10 = int_to_ptr.vmem [resolvable:$true] %s1070_s10 }
 0x113   : > { %p763_p5 = scmp.ne.s32.totalorder %s1065_s14, %s762_s9  ;;  %s896_s21 = smov [#allocation4]  }
 0x114   : > { %s766_s27 = sshll.u32 %s896_s21, 4  ;;  %s767_s27 = int_to_ptr.vmem [resolvable:$false] %s766_s27 }
 0x115   : > { %p764_p6 = pnand %p763_p5, %p981_p3  ;;  %s768_s12 = scalar_lea.vmem %s767_s27, 256 }
 0x116   : > { %p769_p9 = scmp.lt.s32.totalorder %s1065_s14, %s767_s27  ;;  %p770_p10 = scmp.lt.s32.totalorder %s768_s12, %s762_s9 }
 0x117   : > { %p765_p7 = pneg %p764_p6 }
 0x118   : > { %p771_p11 = por %p770_p10, %p769_p9 }
 0x11a   : > { %p772_p12 = pnand %p771_p11, %p765_p7 }
 0x172   : > { %v380_v13 = vpop.permute.xlu0 %379 }
 0x173   : > { %382 = vst.msk [vmem:[%s270_s13] sm:$0xff] %vm376_vm2, %v380_v13 }
 0x174   : > { %775 = shalt.err (!%p772_p12)
}
 0x175   : > { %s776_s13 = scalar_lea.hbm %s1063_s22, 128  ;;  %s780_s21 = scalar_lea.hbm %s1166_s4, 1024 }
 0x176   : > { %p777_p13 = scmp.ne.s32.totalorder %s1063_s22, %s776_s13  ;;  %p781_p2 = scmp.lt.u32.totalorder %s1063_s22, %s1166_s4 }
 0x177   : > { %p782_p4 = scmp.lt.u32.totalorder %s780_s21, %s776_s13  ;;  %p784_p6 = scmp.lt.u32.totalorder %s776_s13, %s1063_s22 }
 0x178   : > { %p778_p0 = pnand %p777_p13, %p981_p3 }
 0x179   : > { %p783_p5 = por %p782_p4, %p781_p2 }
 0x17a   : > { %p779_p1 = pneg %p778_p0 }
 0x17b   : > { %p785_p7 = por %p784_p6, %p783_p5 }
 0x17d   : > { %p786_p9 = pnand %p785_p7, %p779_p1 }
 0x17f   : > { %789 = shalt.err (!%p786_p9)
}
 0x180   : > { %649 = dma.vmem_to_hbm [thread:$0]  (%p981_p3), %s1065_s14, 128, %s1063_s22, %s393_s26  }
 0x181   : > { %s1104_s12 = scalar_lea.hbm %s1167_s5, %s1021_s1  ;;  %v384_v14 = vpop.permute.xlu0 %383  ;;  %s1176_s13 = scalar_lea.vmem [#allocation6], %s1015_s16 }
 0x182   : > { %386 = vst.msk [vmem:[%s1176_s13] sm:$0xff] %vm376_vm2, %v384_v14  ;;  %s790_s17 = scalar_lea.vmem %s1098_s10, 128  ;;  %s897_s14 = smov [#allocation6]  }
 0x183   : > { %p791_p10 = scmp.ne.s32.totalorder %s1098_s10, %s790_s17  ;;  %s794_s22 = sshll.u32 %s897_s14, 4  ;;  %s795_s22 = int_to_ptr.vmem [resolvable:$false] %s794_s22 }
 0x184   : > { %s796_s30 = scalar_lea.vmem %s795_s22, 256  ;;  %p797_p13 = scmp.lt.s32.totalorder %s1098_s10, %s795_s22 }
 0x185   : > { %p792_p11 = pnand %p791_p10, %p981_p3  ;;  %p798_p0 = scmp.lt.s32.totalorder %s796_s30, %s790_s17 }
 0x187   : > { %p793_p12 = pneg %p792_p11  ;;  %p799_p1 = por %p798_p0, %p797_p13 }
 0x189   : > { %p800_p2 = pnand %p799_p1, %p793_p12 }
 0x18b   : > { %803 = shalt.err (!%p800_p2)
}
 0x18c   : > { %s804_s1 = scalar_lea.hbm %s1104_s12, 128  ;;  %s808_s27 = scalar_lea.hbm %s1167_s5, 1024 }
 0x18d   : > { %p805_p4 = scmp.ne.s32.totalorder %s1104_s12, %s804_s1  ;;  %p809_p7 = scmp.lt.u32.totalorder %s1104_s12, %s1167_s5 }
 0x18e   : > { %p810_p9 = scmp.lt.u32.totalorder %s808_s27, %s804_s1  ;;  %p812_p11 = scmp.lt.u32.totalorder %s804_s1, %s1104_s12 }
 0x18f   : > { %p806_p5 = pnand %p805_p4, %p981_p3 }
 0x190   : > { %p811_p10 = por %p810_p9, %p809_p7 }
 0x191   : > { %p807_p6 = pneg %p806_p5 }
 0x192   : > { %p813_p12 = por %p812_p11, %p811_p10 }
 0x194   : > { %p814_p13 = pnand %p813_p12, %p807_p6 }
 0x196   : > { %817 = shalt.err (!%p814_p13)
}
 0x197   : > { %650 = dma.vmem_to_hbm [thread:$0]  (%p981_p3), %s1098_s10, 128, %s1104_s12, %s393_s26  }
 0x198 PF: > { %p664_p0 = scmp.ge.s32.totalorder %s888_s25, 2  ;;  %s455_s13 = sand.u32 1, %s860_s18  }
 0x199   : > { %s456_s17 = scalar_lea.sflag [#allocation3], %s455_s13 }
 0x19a   : > { %p655_p1 = pnand %p664_p0, %p992_p8 }
 0x19c   : > { %851 = dma.done.wait (!%p655_p1), %s456_s17, 128  }
 0x19d   : > { %853 = vsyncadd (!%p655_p1), %s456_s17, 4294967168  ;;  %s1177_s14 = sadd.s32 4294967294, %s888_s25  }
 0x19e   : > { %s464_s22 = sand.u32 1, %s1177_s14  }
 0x19f   : > { %s465_s6 = scalar_lea.sflag [#allocation5], %s464_s22 }
 0x1a0   : > { %855 = dma.done.wait (!%p655_p1), %s465_s6, 256  }
 0x1a1   : > { %857 = vsyncadd (!%p655_p1), %s465_s6, 4294967040  ;;  %s22_s25 = sadd.s32 1, %s888_s25   ;;  %s1178_s18 = smov %s864_s19 }
 0x1a2   : > { %p19_p3 = scmp.ge.s32.totalorder %s22_s25, 10   ;;  %s1179_s19 = smov %s868_s20 }
 0x1a3   : > { %s1180_s20 = smov %s1001_s11  ;;  %s1181_s21 = smov %s880_s23 }
 0x1a4   : > { %s1182_s22 = smov %s884_s24  ;;  %s1183_s23 = smov %s1186_s28 }
 0x1a5   : > { %s1184_s24 = smov %s1190_s29  ;;  %21 = sbr.rel (!%p19_p3) target bundleno = 9 (0x9), region = 105 }
 0x1ac   :  { %479 = vsyncpa [#allocation3], 1 }
 0x1ad   :  { %481 = vsyncpa [#allocation3 + $0x1], 1 }
 0x1ae   :  { %482 = vsyncpa [#allocation5], 1 }
 0x1af   :  { %484 = vsyncpa [#allocation5 + $0x1], 1 }

</bundles_post_ra>
